<compile_context>
chip_gen: v5e
topology: v5e:2x2
jax: 0.10.0
libtpu: 0.0.40
codegen_flags: <defaults>
</compile_context>

<pallas_src>
import functools

import jax
import jax.numpy as jnp
from jax.experimental import pallas as pl
from jax.experimental.pallas import tpu as pltpu


def _round_up(x, m):
    return ((x + m - 1) // m) * m


def _mlp_kernel(n_layers_total, state_size, fma_first, w_ref, b_ref, x_ref, out_ref):
    """Fused MLP forward on one batch tile.

    w_ref: [L, P, P] zero-padded weight slab (layer l uses w_ref[l, :in_l, :out_l])
    b_ref: [L, 1, P] zero-padded bias slab
    x_ref: [tile, state_size] (fma_first) or [tile, P] (padded, matmul path)
    out_ref: [tile, P] lane-dense output; valid Q-values live in [:, :action_size]
    """
    tile = x_ref.shape[0]
    P = w_ref.shape[2]

    # ---- layer 0 ----
    if fma_first:
        # K is tiny (e.g. 3): do it as broadcast-FMAs on the VPU, keep MXU for
        # the wide layers.  Zero-padded weight columns keep padded lanes at 0.
        x = x_ref[...]                      # [tile, S]
        w0 = w_ref[0]                       # [P, P]
        h = jnp.zeros((tile, P), jnp.float32)
        for k in range(state_size):
            h = h + x[:, k : k + 1] * w0[k : k + 1, :]
        h = h + b_ref[0]
    else:
        h = (
            jnp.dot(x_ref[...], w_ref[0], preferred_element_type=jnp.float32)
            + b_ref[0]
        )
    if n_layers_total > 1:                  # layer 0 is a hidden layer -> ReLU
        h = jnp.maximum(h, 0.0)

    # ---- layers 1 .. L-1 ----
    for i in range(1, n_layers_total):
        h = jnp.dot(h, w_ref[i], preferred_element_type=jnp.float32) + b_ref[i]
        if i < n_layers_total - 1:
            h = jnp.maximum(h, 0.0)

    out_ref[...] = h.astype(out_ref.dtype)


def pack_params(weights, biases):
    """Pack per-layer [in,out] weights and [1,out] biases into padded slabs.

    Returns (w_slab [L, P, P], b_slab [L, 1, P]) with zero padding, where
    P = round_up(max layer dim, 128).  Zero padding keeps the padded lanes of
    every intermediate activation exactly zero, so results are unchanged.
    """
    L = len(weights)
    max_dim = max([w.shape[0] for w in weights] + [w.shape[1] for w in weights])
    P = max(128, _round_up(max_dim, 128))
    w_slab = jnp.zeros((L, P, P), jnp.float32)
    b_slab = jnp.zeros((L, 1, P), jnp.float32)
    for i, (w, b) in enumerate(zip(weights, biases)):
        w_slab = w_slab.at[i, : w.shape[0], : w.shape[1]].set(w.astype(jnp.float32))
        b_slab = b_slab.at[i, :, : b.shape[1]].set(b.astype(jnp.float32))
    return w_slab, b_slab


def qnetwork_forward(x, w_slab, b_slab, state_size, action_size, *, max_tile=512):
    """x: [batch, state_size] float32 -> [batch, action_size] float32 Q-values."""
    batch = x.shape[0]
    L, P, _ = w_slab.shape
    n_layers_total = L

    # Batch tiling: tile rows per grid step (multiple of 8), batch padded to a
    # whole number of tiles.
    tile = min(max_tile, _round_up(max(batch, 1), 8))
    padded_batch = _round_up(batch, tile)
    grid = (padded_batch // tile,)

    fma_first = state_size <= 16
    if fma_first:
        x_in_width = state_size
    else:
        x_in_width = P  # matmul path needs x padded to the slab row width
    x_pad = jnp.zeros((padded_batch, x_in_width), jnp.float32)
    x_pad = x_pad.at[:batch, :state_size].set(x.astype(jnp.float32))

    kernel = functools.partial(_mlp_kernel, n_layers_total, state_size, fma_first)

    out = pl.pallas_call(
        kernel,
        out_shape=jax.ShapeDtypeStruct((padded_batch, P), jnp.float32),
        grid=grid,
        in_specs=[
            # Parameter slabs: one full-extent block, VMEM-resident across tiles.
            pl.BlockSpec((L, P, P), lambda i: (0, 0, 0)),
            pl.BlockSpec((L, 1, P), lambda i: (0, 0, 0)),
            # Activations: tiled along the batch axis.
            pl.BlockSpec((tile, x_in_width), lambda i: (i, 0)),
        ],
        # Lane-dense output block; valid columns sliced in the wrapper.
        out_specs=pl.BlockSpec((tile, P), lambda i: (i, 0)),
        compiler_params=pltpu.CompilerParams(
            dimension_semantics=("parallel",),  # megacore sharding on v7x
        ),
    )(w_slab, b_slab, x_pad)

    return out[:batch, :action_size]


def init_qnetwork_params(key, state_size, action_size, num_layers, num_neurons):
    """PyTorch-style nn.Linear init: U(-1/sqrt(fan_in), 1/sqrt(fan_in))."""
    dims = [state_size] + [num_neurons] * num_layers + [action_size]
    weights, biases = [], []
    for i in range(len(dims) - 1):
        fan_in, fan_out = dims[i], dims[i + 1]
        key, kw, kb = jax.random.split(key, 3)
        bound = 1.0 / jnp.sqrt(jnp.float32(fan_in))
        # stored as [in, out] (transpose of PyTorch's [out, in])
        w = jax.random.uniform(kw, (fan_in, fan_out), jnp.float32, -bound, bound)
        b = jax.random.uniform(kb, (1, fan_out), jnp.float32, -bound, bound)
        weights.append(w)
        biases.append(b)
    return weights, biases


def qnetwork_reference(x, weights, biases):
    """Pure-JAX reference for correctness checking."""
    h = x
    n = len(weights)
    for i, (w, b) in enumerate(zip(weights, biases)):
        h = h @ w + b
        if i < n - 1:
            h = jnp.maximum(h, 0.0)
    return h


if __name__ == "__main__":
    # Matches the Blackjack QNetwork: state_size=3, action_size=2.
    state_size = 3
    action_size = 2
    num_layers = 2
    num_neurons = 32

    key = jax.random.PRNGKey(0)
    key, kparam = jax.random.split(key)
    weights, biases = init_qnetwork_params(
        kparam, state_size, action_size, num_layers, num_neurons
    )
    w_slab, b_slab = pack_params(weights, biases)

    # Small batch (single tile) ...
    key, kx1 = jax.random.split(key)
    x_small = jax.random.uniform(kx1, (8, state_size), jnp.float32, 0.0, 21.0)
    out_small = jax.block_until_ready(
        qnetwork_forward(x_small, w_slab, b_slab, state_size, action_size)
    )
    ref_small = qnetwork_reference(x_small, weights, biases)
    assert out_small.shape == (8, action_size)
    assert jnp.allclose(out_small, ref_small, atol=1e-5, rtol=1e-5)

    # ... and a vectorized-env style batch that exercises the grid + padding.
    key, kx2 = jax.random.split(key)
    x_big = jax.random.uniform(kx2, (1000, state_size), jnp.float32, 0.0, 21.0)
    out_big = jax.block_until_ready(
        qnetwork_forward(x_big, w_slab, b_slab, state_size, action_size)
    )
    ref_big = qnetwork_reference(x_big, weights, biases)
    assert out_big.shape == (1000, action_size)
    assert jnp.allclose(out_big, ref_big, atol=1e-5, rtol=1e-5)

    print("KERNEL_OK")
</pallas_src>

<mosaic_0001>
module attributes {stable_mosaic.version = 11 : i64} {
  func.func @_mlp_kernel(%arg0: i32, %arg1: memref<3x128x128xf32, #tpu.memory_space<vmem>>, %arg2: memref<3x1x128xf32, #tpu.memory_space<vmem>>, %arg3: memref<8x3xf32, #tpu.memory_space<vmem>>, %arg4: memref<8x128xf32, #tpu.memory_space<vmem>>) attributes {dimension_semantics = [#tpu.dimension_semantics<parallel>], iteration_bounds = array<i64: 1>, scalar_prefetch = 0 : i64, scratch_operands = 0 : i64, tpu.core_type = #tpu.core_type<tc>, window_params = [{pipeline_mode = #tpu.pipeline_mode<synchronous>, transform_indices = @transform_0, window_bounds = array<i64: 3, 128, 128>}, {pipeline_mode = #tpu.pipeline_mode<synchronous>, transform_indices = @transform_1, window_bounds = array<i64: 3, 1, 128>}, {transform_indices = @transform_2, window_bounds = array<i64: 8, 3>}, {transform_indices = @transform_3, window_bounds = array<i64: 8, 128>}]} {
    %c0 = arith.constant 0 : index
    %c0_0 = arith.constant 0 : index
    %0 = vector.load %arg3[%c0, %c0_0] : memref<8x3xf32, #tpu.memory_space<vmem>>, vector<8x3xf32>
    %c0_1 = arith.constant 0 : index
    %c0_2 = arith.constant 0 : index
    %c0_3 = arith.constant 0 : index
    %1 = vector.load %arg1[%c0_1, %c0_2, %c0_3] : memref<3x128x128xf32, #tpu.memory_space<vmem>>, vector<1x128x128xf32>
    %2 = vector.shape_cast %1 : vector<1x128x128xf32> to vector<128x128xf32>
    %cst = arith.constant 0.000000e+00 : f32
    %3 = vector.broadcast %cst : f32 to vector<8x128xf32>
    %4 = vector.extract_strided_slice %0 {offsets = [0, 0], sizes = [8, 1], strides = [1, 1]} : vector<8x3xf32> to vector<8x1xf32>
    %5 = vector.extract_strided_slice %2 {offsets = [0, 0], sizes = [1, 128], strides = [1, 1]} : vector<128x128xf32> to vector<1x128xf32>
    %6 = vector.broadcast %4 : vector<8x1xf32> to vector<8x128xf32>
    %7 = vector.broadcast %5 : vector<1x128xf32> to vector<8x128xf32>
    %8 = arith.mulf %6, %7 : vector<8x128xf32>
    %9 = arith.addf %3, %8 : vector<8x128xf32>
    %10 = vector.extract_strided_slice %0 {offsets = [0, 1], sizes = [8, 1], strides = [1, 1]} : vector<8x3xf32> to vector<8x1xf32>
    %11 = vector.extract_strided_slice %2 {offsets = [1, 0], sizes = [1, 128], strides = [1, 1]} : vector<128x128xf32> to vector<1x128xf32>
    %12 = vector.broadcast %10 : vector<8x1xf32> to vector<8x128xf32>
    %13 = vector.broadcast %11 : vector<1x128xf32> to vector<8x128xf32>
    %14 = arith.mulf %12, %13 : vector<8x128xf32>
    %15 = arith.addf %9, %14 : vector<8x128xf32>
    %16 = vector.extract_strided_slice %0 {offsets = [0, 2], sizes = [8, 1], strides = [1, 1]} : vector<8x3xf32> to vector<8x1xf32>
    %17 = vector.extract_strided_slice %2 {offsets = [2, 0], sizes = [1, 128], strides = [1, 1]} : vector<128x128xf32> to vector<1x128xf32>
    %18 = vector.broadcast %16 : vector<8x1xf32> to vector<8x128xf32>
    %19 = vector.broadcast %17 : vector<1x128xf32> to vector<8x128xf32>
    %20 = arith.mulf %18, %19 : vector<8x128xf32>
    %21 = arith.addf %15, %20 : vector<8x128xf32>
    %c0_4 = arith.constant 0 : index
    %c0_5 = arith.constant 0 : index
    %c0_6 = arith.constant 0 : index
    %22 = vector.load %arg2[%c0_4, %c0_5, %c0_6] : memref<3x1x128xf32, #tpu.memory_space<vmem>>, vector<1x1x128xf32>
    %23 = vector.shape_cast %22 : vector<1x1x128xf32> to vector<1x128xf32>
    %24 = vector.broadcast %23 : vector<1x128xf32> to vector<8x128xf32>
    %25 = arith.addf %21, %24 : vector<8x128xf32>
    %cst_7 = arith.constant 0.000000e+00 : f32
    %26 = vector.broadcast %cst_7 : f32 to vector<8x128xf32>
    %27 = arith.maximumf %25, %26 : vector<8x128xf32>
    %c1 = arith.constant 1 : index
    %c0_8 = arith.constant 0 : index
    %c0_9 = arith.constant 0 : index
    %28 = vector.load %arg1[%c1, %c0_8, %c0_9] : memref<3x128x128xf32, #tpu.memory_space<vmem>>, vector<1x128x128xf32>
    %29 = vector.shape_cast %28 : vector<1x128x128xf32> to vector<128x128xf32>
    %cst_10 = arith.constant dense<0.000000e+00> : vector<8x128xf32>
    %30 = tpu.matmul %27, %29, %cst_10 {dimension_numbers = #tpu.dot_dimension_numbers<[1], [0], [0], [1], [0, 0, 1, 1], [], []>} : vector<8x128xf32>, vector<128x128xf32>, vector<8x128xf32> -> vector<8x128xf32>
    %c1_11 = arith.constant 1 : index
    %c0_12 = arith.constant 0 : index
    %c0_13 = arith.constant 0 : index
    %31 = vector.load %arg2[%c1_11, %c0_12, %c0_13] : memref<3x1x128xf32, #tpu.memory_space<vmem>>, vector<1x1x128xf32>
    %32 = vector.shape_cast %31 : vector<1x1x128xf32> to vector<1x128xf32>
    %33 = vector.broadcast %32 : vector<1x128xf32> to vector<8x128xf32>
    %34 = arith.addf %30, %33 : vector<8x128xf32>
    %cst_14 = arith.constant 0.000000e+00 : f32
    %35 = vector.broadcast %cst_14 : f32 to vector<8x128xf32>
    %36 = arith.maximumf %34, %35 : vector<8x128xf32>
    %c2 = arith.constant 2 : index
    %c0_15 = arith.constant 0 : index
    %c0_16 = arith.constant 0 : index
    %37 = vector.load %arg1[%c2, %c0_15, %c0_16] : memref<3x128x128xf32, #tpu.memory_space<vmem>>, vector<1x128x128xf32>
    %38 = vector.shape_cast %37 : vector<1x128x128xf32> to vector<128x128xf32>
    %cst_17 = arith.constant dense<0.000000e+00> : vector<8x128xf32>
    %39 = tpu.matmul %36, %38, %cst_17 {dimension_numbers = #tpu.dot_dimension_numbers<[1], [0], [0], [1], [0, 0, 1, 1], [], []>} : vector<8x128xf32>, vector<128x128xf32>, vector<8x128xf32> -> vector<8x128xf32>
    %c2_18 = arith.constant 2 : index
    %c0_19 = arith.constant 0 : index
    %c0_20 = arith.constant 0 : index
    %40 = vector.load %arg2[%c2_18, %c0_19, %c0_20] : memref<3x1x128xf32, #tpu.memory_space<vmem>>, vector<1x1x128xf32>
    %41 = vector.shape_cast %40 : vector<1x1x128xf32> to vector<1x128xf32>
    %42 = vector.broadcast %41 : vector<1x128xf32> to vector<8x128xf32>
    %43 = arith.addf %39, %42 : vector<8x128xf32>
    %c0_21 = arith.constant 0 : index
    %c0_22 = arith.constant 0 : index
    %44 = vector.load %arg4[%c0_21, %c0_22] : memref<8x128xf32, #tpu.memory_space<vmem>>, vector<8x128xf32>
    tpu.vector_store %arg4[%c0_21, %c0_22], %43 {strides = array<i32>} : memref<8x128xf32, #tpu.memory_space<vmem>>, vector<8x128xf32>,
    return
  }
  func.func @transform_0(%arg0: i32) -> (i32, i32, i32) {
    %c0_i32 = arith.constant 0 : i32
    %c0_i32_0 = arith.constant 0 : i32
    %c0_i32_1 = arith.constant 0 : i32
    %c0_i32_2 = arith.constant 0 : i32
    return %c0_i32, %c0_i32_0, %c0_i32_1 : i32, i32, i32
  }
  func.func @transform_1(%arg0: i32) -> (i32, i32, i32) {
    %c0_i32 = arith.constant 0 : i32
    %c0_i32_0 = arith.constant 0 : i32
    %c0_i32_1 = arith.constant 0 : i32
    %c0_i32_2 = arith.constant 0 : i32
    return %c0_i32, %c0_i32_0, %c0_i32_1 : i32, i32, i32
  }
  func.func @transform_2(%arg0: i32) -> (i32, i32) {
    %c0_i32 = arith.constant 0 : i32
    %c0_i32_0 = arith.constant 0 : i32
    return %arg0, %c0_i32 : i32, i32
  }
  func.func @transform_3(%arg0: i32) -> (i32, i32) {
    %c0_i32 = arith.constant 0 : i32
    %c0_i32_0 = arith.constant 0 : i32
    return %arg0, %c0_i32 : i32, i32
  }
}

</mosaic_0001>

<bundles_post_ra>
// kernel: tpu_custom_call.1
= control target key start
LH: loop header
LB: loop body
LE: loop exit
PB: predicated region body
PF: predicated region fallthrough
CT: control target
= control target key end

     0   :  { %8 = vsyncpa [#allocation3], 0  ;;  %s277_s0 = inlined_call_operand.hbm [shape: f32[3,128,128], index: 0, kind: input, shape index: {}]   ;;  %s278_s1 = inlined_call_operand.vmem [shape: f32[3,1,128], index: 1, kind: input, shape index: {}]   ;;  %s279_s2 = inlined_call_operand.vmem [shape: f32[8,3], index: 2, kind: input, shape index: {}]   ;;  %s280_s3 = inlined_call_operand.hbm [shape: f32[8,128], index: 3, kind: output, shape index: {}]  }
   0x1   :  { %9 = vsyncpa [#allocation4], 0  ;;  %s14_s14 = sshll.u32 %s277_s0, 4  ;;  %s232_s15 = smov [#allocation2]   ;;  %s15_s14 = int_to_ptr.hbm [resolvable:$true] %s14_s14 }
   0x2   :  { %s16_s16 = sshll.u32 %s232_s15, 4  ;;  %s233_s17 = smov 128   ;;  %s17_s16 = int_to_ptr.vmem [resolvable:$true] %s16_s16 }
   0x3   :  { %s234_s18 = smov 8  }
   0x4   :  { %22 = dma.hbm_to_vmem [thread:$0]  %s15_s14, 6144, %s17_s16, [#allocation3], %s233_s17, %s233_s17, %s234_s18  }
   0x5   :  { %228 = dma.done.wait [#allocation3], 6144  }
   0x6   :  { %229 = vsyncadd [#allocation3], 4294961152  ;;  %v235_v0 = vmov 0   ;;  %v236_v1 = vmov 2   ;;  %v31_v2 = vld [vmem:[%s279_s2] sm:$0xff]  ;;  %v77_v3 = vld [vmem:[#allocation2 + $0xf8] sm:$0xff] }
   0x7   :  { %173 = vset.pattern.permute.xlu0 %v235_v0  ;;  %175 = vset.pattern.permute.xlu1 %v236_v1  ;;  %v76_v4 = vld [vmem:[#allocation2 + $0xf0] sm:$0xff]  ;;  %v75_v5 = vld [vmem:[#allocation2 + $0xe8] sm:$0xff]  ;;  %v74_v6 = vld [vmem:[#allocation2 + $0xe0] sm:$0xff]  ;;  %v237_v8 = vmov 1   ;;  %s238_s25 = smov [#allocation5]   ;;  %s154_s29 = sshll.u32 %s280_s3, 4  ;;  %s155_s29 = int_to_ptr.hbm [resolvable:$true] %s154_s29 }
   0x8   :  { %35 = vperm.xlu0 %173, %v31_v2   ;;  %49 = vperm.xlu1 %175, %v31_v2   ;;  %v73_v7 = vld [vmem:[#allocation2 + $0xd8] sm:$0xff]  ;;  %v72_v9 = vld [vmem:[#allocation2 + $0xd0] sm:$0xff]  ;;  %v71_v10 = vld [vmem:[#allocation2 + $0xc8] sm:$0xff]  ;;  %s152_s26 = sshll.u32 %s238_s25, 4  ;;  %s153_s26 = int_to_ptr.vmem [resolvable:$true] %s152_s26 }
   0x9   :  { %83 = vmatpush.msra.mxu0 %v77_v3  ;;  %v70_v11 = vld [vmem:[#allocation2 + $0xc0] sm:$0xff]  ;;  %v69_v12 = vld [vmem:[#allocation2 + $0xb8] sm:$0xff]  ;;  %v68_v13 = vld [vmem:[#allocation2 + $0xb0] sm:$0xff] }
   0xa   :  { %v67_v14 = vld [vmem:[#allocation2 + $0xa8] sm:$0xff]  ;;  %v66_v15 = vld [vmem:[#allocation2 + $0xa0] sm:$0xff]  ;;  %v65_v16 = vld [vmem:[#allocation2 + $0x98] sm:$0xff] }
   0xb   :  { %84 = vmatpush.msra.mxu0 %v76_v4  ;;  %v64_v17 = vld [vmem:[#allocation2 + $0x90] sm:$0xff]  ;;  %v63_v18 = vld [vmem:[#allocation2 + $0x88] sm:$0xff]  ;;  %v62_v19 = vld [vmem:[#allocation2 + $0x80] sm:$0xff] }
   0xc   :  { %v120_v20 = vld [vmem:[#allocation2 + $0x178] sm:$0xff]  ;;  %v119_v21 = vld [vmem:[#allocation2 + $0x170] sm:$0xff]  ;;  %v118_v22 = vld [vmem:[#allocation2 + $0x168] sm:$0xff] }
   0xd   :  { %85 = vmatpush.msra.mxu0 %v75_v5  ;;  %126 = vmatpush.msra.mxu1 %v120_v20  ;;  %v117_v23 = vld [vmem:[#allocation2 + $0x160] sm:$0xff]  ;;  %v116_v24 = vld [vmem:[#allocation2 + $0x158] sm:$0xff]  ;;  %v115_v25 = vld [vmem:[#allocation2 + $0x150] sm:$0xff] }
   0xe   :  { %v114_v26 = vld [vmem:[#allocation2 + $0x148] sm:$0xff]  ;;  %v113_v28 = vld [vmem:[#allocation2 + $0x140] sm:$0xff]  ;;  %v112_v29 = vld [vmem:[#allocation2 + $0x138] sm:$0xff] }
   0xf   :  { %86 = vmatpush.msra.mxu0 %v74_v6  ;;  %127 = vmatpush.msra.mxu1 %v119_v21  ;;  %v32_v30 = vld [vmem:[#allocation2] sm:$0xff]  ;;  %v111_v31 = vld [vmem:[#allocation2 + $0x130] sm:$0xff]  ;;  %v110_v35 = vld [vmem:[#allocation2 + $0x128] sm:$0xff] }
  0x10   :  { %174 = vset.pattern.permute.xlu0 %v237_v8  ;;  %v38_v32 = vperm.slane %v32_v30, 0  ;;  %v45_v33 = vperm.slane %v32_v30, 1  ;;  %v52_v34 = vperm.slane %v32_v30, 2  ;;  %v109_v37 = vld [vmem:[#allocation2 + $0x120] sm:$0xff]  ;;  %v108_v42 = vld [vmem:[#allocation2 + $0x118] sm:$0xff]  ;;  %v107_v48 = vld [vmem:[#allocation2 + $0x110] sm:$0xff] }
  0x11   :  { %42 = vperm.xlu0 %174, %v31_v2   ;;  %87 = vmatpush.msra.mxu0 %v73_v7  ;;  %v177_v44 = vld [vmem:[%s278_s1] ss:$0 sm:$0xff]  ;;  %v106_v49 = vld [vmem:[#allocation2 + $0x108] sm:$0xff]  ;;  %v178_v51 = vld [vmem:[%s278_s1 + $0x1] ss:$0 sm:$0xff] }
  0x12   :  { %128 = vmatpush.msra.mxu1 %v118_v22  ;;  %v105_v50 = vld [vmem:[#allocation2 + $0x100] sm:$0xff] }
  0x13   :  { %88 = vmatpush.msra.mxu0 %v72_v9  ;;  %v179_v55 = vld [vmem:[%s278_s1 + $0x2] ss:$0 sm:$0xff] }
  0x14   :  { %129 = vmatpush.msra.mxu1 %v117_v23 }
  0x15   :  { %89 = vmatpush.msra.mxu0 %v71_v10 }
  0x16   :  { %130 = vmatpush.msra.mxu1 %v116_v24 }
  0x17   :  { %90 = vmatpush.msra.mxu0 %v70_v11 }
  0x18   :  { %131 = vmatpush.msra.mxu1 %v115_v25 }
  0x19   :  { %176 = vset.pattern.permute.xlu0 %v236_v1  ;;  %91 = vmatpush.msra.mxu0 %v69_v12 }
  0x1a   :  { %132 = vmatpush.msra.mxu1 %v114_v26 }
  0x1b   :  { %92 = vmatpush.msra.mxu0 %v68_v13 }
  0x1c   :  { %133 = vmatpush.msra.mxu1 %v113_v28 }
  0x1d   :  { %93 = vmatpush.msra.mxu0 %v67_v14 }
  0x1e   :  { %134 = vmatpush.msra.mxu1 %v112_v29 }
  0x1f   :  { %94 = vmatpush.msra.mxu0 %v66_v15 }
  0x20   :  { %135 = vmatpush.msra.mxu1 %v111_v31 }
  0x21   :  { %95 = vmatpush.msra.mxu0 %v65_v16 }
  0x22   :  { %136 = vmatpush.msra.mxu1 %v110_v35 }
  0x23   :  { %96 = vmatpush.msra.mxu0 %v64_v17 }
  0x24   :  { %137 = vmatpush.msra.mxu1 %v109_v37 }
  0x25   :  { %97 = vmatpush.msra.mxu0 %v63_v18 }
  0x26   :  { %138 = vmatpush.msra.mxu1 %v108_v42 }
  0x27   :  { %98 = vmatpush.msra.mxu0 %v62_v19 }
  0x28   :  { %139 = vmatpush.msra.mxu1 %v107_v48 }
  0x2a   :  { %140 = vmatpush.msra.mxu1 %v106_v49 }
  0x2c   :  { %141 = vmatpush.msra.mxu1 %v105_v50 }
  0x7a   :  { %v36_v27 = vpop.permute.xlu0 %35  ;;  %v50_v36 = vpop.permute.xlu1 %49 }
  0x7b   :  { %v39_v39 = vmul.f32 %v38_v32, %v36_v27  ;;  %v53_v41 = vmul.f32 %v52_v34, %v50_v36 }
  0x83   :  { %v43_v38 = vpop.permute.xlu0 %42 }
  0x84   :  { %v46_v40 = vmul.f32 %v45_v33, %v43_v38 }
  0x86   :  { %v47_v43 = vadd.f32 %v46_v40, %v39_v39 }
  0x88   :  { %v54_v45 = vadd.f32 %v53_v41, %v47_v43 }
  0x8a   :  { %v59_v46 = vadd.f32 %v177_v44, %v54_v45 }
  0x8c   :  { %v60_v47 = vmax.f32 %v59_v46, 0.0 }
  0x8e   :  { %99 = vmatmul.f32.vlgmr.msra.gmra.mxu0 %v60_v47 }
 0x10b   :  { %v100_v52 = vpop.f32.mrf.mxu0 }
 0x10c   :  { %v101_v53 = vadd.f32 %v178_v51, %v100_v52 }
 0x10e   :  { %v103_v54 = vmax.f32 %v101_v53, 0.0 }
 0x110   :  { %142 = vmatmul.f32.vlgmr.msra.gmra.mxu1 %v103_v54 }
 0x18d   :  { %v143_v56 = vpop.f32.mrf.mxu1 }
 0x18e   :  { %v144_v57 = vadd.f32 %v179_v55, %v143_v56 }
 0x190   :  { %146 = vst [vmem:[#allocation5] sm:$0xff] %v144_v57 }
 0x191   :  { %157 = dma.vmem_to_hbm [thread:$0]  %s153_s26, 128, %s155_s29, [#allocation4]  }
 0x192   :  { %230 = dma.done.wait [#allocation4], 128  }
 0x193   :  { %231 = vsyncadd [#allocation4], 4294967168 }
 0x194   :  { %162 = vsyncpa [#allocation3], 1 }
 0x195   :  { %163 = vsyncpa [#allocation4], 1 }

</bundles_post_ra>
